<compile_context>
chip_gen: v5e
topology: v5e:2x2
jax: 0.10.0
libtpu: 0.0.40
codegen_flags: <defaults>
</compile_context>

<pallas_src>
import functools

import jax
import jax.numpy as jnp
from jax import lax
from jax.experimental import pallas as pl
from jax.experimental.pallas import tpu as pltpu


def _round_up(x, d):
    return ((x + d - 1) // d) * d


def _pick_tile(total, align, cap, floor):
    """Largest multiple of `align` that divides `total` and is <= cap.
    If no such divisor >= floor exists, return cap (caller re-pads)."""
    cap = max(align, min(cap, total))
    best = None
    cand = align
    while cand <= cap:
        if total % cand == 0:
            best = cand
        cand += align
    if best is None or best < min(floor, total):
        return cap
    return best


def _finalize(acc, b_row, apply_activation_fn, activation_fn):
    out = acc + b_row
    if apply_activation_fn and activation_fn is not None:
        if callable(activation_fn):
            out = activation_fn(out)
        else:
            name = str(activation_fn).lower()
            if name == "sigmoid":
                out = jax.nn.sigmoid(out)      # EUP slot — effectively free
            elif name == "relu":
                out = jnp.maximum(out, 0.0)
            elif name == "tanh":
                out = jnp.tanh(out)
            elif name in ("identity", "none", ""):
                pass
            else:
                raise ValueError(f"unsupported activation: {activation_fn}")
    return out


# ---------------- kernels -------------------------------------------------

def _proj_kernel_kres(x_ref, w_ref, b_ref, o_ref, *, feed_dtype,
                      apply_activation_fn, activation_fn):
    """K fully resident (single K step): dot + bias + act straight to o_ref."""
    acc = lax.dot_general(
        x_ref[...].astype(feed_dtype), w_ref[...],
        dimension_numbers=(((1,), (1,)), ((), ())),
        preferred_element_type=jnp.float32)
    out = _finalize(acc, b_ref[...], apply_activation_fn, activation_fn)
    o_ref[...] = out.astype(o_ref.dtype)


def _proj_kernel_ksplit_f32(x_ref, w_ref, b_ref, o_ref, *, feed_dtype,
                            apply_activation_fn, activation_fn):
    """K split, f32 output: accumulate directly into o_ref (no scratch)."""
    kk = pl.program_id(2)

    @pl.when(kk == 0)
    def _():
        o_ref[...] = jnp.zeros_like(o_ref)

    o_ref[...] += lax.dot_general(
        x_ref[...].astype(feed_dtype), w_ref[...],
        dimension_numbers=(((1,), (1,)), ((), ())),
        preferred_element_type=jnp.float32)

    @pl.when(kk == pl.num_programs(2) - 1)
    def _():
        o_ref[...] = _finalize(o_ref[...], b_ref[...],
                               apply_activation_fn, activation_fn)


def _proj_kernel_ksplit(x_ref, w_ref, b_ref, o_ref, acc_ref, *, feed_dtype,
                        apply_activation_fn, activation_fn):
    """K split, non-f32 output: f32 VMEM accumulator scratch."""
    kk = pl.program_id(2)

    @pl.when(kk == 0)
    def _():
        acc_ref[...] = jnp.zeros_like(acc_ref)

    acc_ref[...] += lax.dot_general(
        x_ref[...].astype(feed_dtype), w_ref[...],
        dimension_numbers=(((1,), (1,)), ((), ())),
        preferred_element_type=jnp.float32)

    @pl.when(kk == pl.num_programs(2) - 1)
    def _():
        out = _finalize(acc_ref[...], b_ref[...],
                        apply_activation_fn, activation_fn)
        o_ref[...] = out.astype(o_ref.dtype)


# ---------------- wrapper -------------------------------------------------

def custom_projection(x, weight, bias=None, *, apply_activation_fn=False,
                      activation_fn="sigmoid", matmul_dtype=jnp.bfloat16):
    """Pallas equivalent of nn.Linear(input_units, num_units) + optional act.

    x:      [..., input_units]
    weight: [num_units, input_units]   (PyTorch Linear convention)
    bias:   [num_units] or None
    matmul_dtype: MXU feed dtype (bf16 default, f32 accumulation); None => x.dtype.
    """
    orig_shape = x.shape
    k = orig_shape[-1]
    n = weight.shape[0]
    assert weight.shape[1] == k, "weight must be [num_units, input_units]"
    x2d = x.reshape(-1, k)
    m = x2d.shape[0]

    out_dtype = x.dtype
    x_bytes = jnp.dtype(x.dtype).itemsize
    feed_dtype = (jnp.dtype(matmul_dtype) if matmul_dtype is not None
                  else jnp.dtype(x.dtype))
    feed_bytes = feed_dtype.itemsize
    out_bytes = jnp.dtype(out_dtype).itemsize

    if bias is None:
        bias = jnp.zeros((n,), jnp.float32)

    # ---- generation-aware VMEM budget ------------------------------------
    try:
        vmem_cap = int(pltpu.get_tpu_info().vmem_capacity_bytes)
    except Exception:
        vmem_cap = 64 * 1024 * 1024          # conservative (v7x per-TC VMEM)
    budget = int(vmem_cap * 0.60)            # headroom for Mosaic internal scratch

    # ---- padded problem extents ------------------------------------------
    pack_m = {4: 8, 2: 16, 1: 32}.get(x_bytes, 8)   # sublane packing of x tiles
    n_pad = _round_up(n, 256) if n > 128 else _round_up(n, 128)  # 256x256 MXU fill
    k_pad = _round_up(k, 128)
    m_pad = _round_up(m, pack_m)

    def vmem_est(tm_, tn_, tk_, k_steps_):
        e = (2 * tm_ * tk_ * x_bytes          # x tile, double-buffered
             + 2 * tn_ * tk_ * feed_bytes     # weight tile, double-buffered
             + 2 * tm_ * tn_ * out_bytes      # out tile, double-buffered
             + 2 * tn_ * 4                    # bias row (f32)
             + tm_ * tk_ * feed_bytes)        # in-kernel bf16 cast of x tile
        if k_steps_ > 1 and out_dtype != jnp.float32:
            e += tm_ * tn_ * 4                # f32 accumulator scratch
        return int(e * 1.2)                   # Mosaic-internal fudge

    # ---- N tile (relief valve #1: tile N before ever crushing tk/tm) ------
    align_n = 256 if (n_pad % 256 == 0) else 128
    tn_cap = n_pad if n_pad <= 2048 else 1024
    tn = _pick_tile(n_pad, align_n, tn_cap, min(256, n_pad))

    # ---- K tile: keep the whole contraction VMEM-resident when it fits ----
    if vmem_est(min(256, m_pad), tn, k_pad, 1) <= budget:
        tk = k_pad
    else:
        tk = _pick_tile(k_pad, 128, 2048, 512)
        while vmem_est(pack_m, tn, tk, 2) > budget and tk > 512:
            tk = max(512, (tk // 2) // 128 * 128)
        while vmem_est(pack_m, tn, tk, 2) > budget and tn > 256:
            tn = max(256, (tn // 2) // 128 * 128)

    n_pad_f = _round_up(n_pad, tn)
    k_pad_f = _round_up(k_pad, tk)
    k_steps = k_pad_f // tk

    # ---- M tile: largest that still fits the budget ------------------------
    tm_cap = pack_m
    while tm_cap * 2 <= 1024 and vmem_est(tm_cap * 2, tn, tk, k_steps) <= budget:
        tm_cap *= 2
    tm = _pick_tile(m_pad, pack_m, tm_cap, min(128, m_pad))

    m_pad_f = _round_up(m_pad, tm)
    grid_m = m_pad_f // tm
    grid_n = n_pad_f // tn

    # Guarantee >= 2 parallel blocks when possible (v7x has 2 TensorCores).
    if grid_m * grid_n == 1 and m_pad >= 2 * pack_m:
        tm = _round_up(max(pack_m, m_pad // 2), pack_m)
        m_pad_f = _round_up(m_pad, tm)
        grid_m = m_pad_f // tm

    # ---- pad operands only when actually needed ----------------------------
    if (m_pad_f, k_pad_f) != (m, k):
        x2d = jnp.pad(x2d, ((0, m_pad_f - m), (0, k_pad_f - k)))
    w_p = weight.astype(feed_dtype)   # cast once: weight is re-read per M tile
    if (n_pad_f, k_pad_f) != (n, k):
        w_p = jnp.pad(w_p, ((0, n_pad_f - n), (0, k_pad_f - k)))
    b_p = bias.astype(jnp.float32)
    if n_pad_f != n:
        b_p = jnp.pad(b_p, (0, n_pad_f - n))
    b2d = b_p.reshape(1, n_pad_f)

    common = dict(feed_dtype=feed_dtype,
                  apply_activation_fn=apply_activation_fn,
                  activation_fn=activation_fn)

    need = vmem_est(tm, tn, tk, k_steps)
    vmem_limit = int(min(vmem_cap - (4 << 20), max(32 << 20, need + (8 << 20))))

    # TODO(synk): if DMA is exposed for very large K (k_steps >= 4), sweep
    # pipeline_mode=pl.Buffered(3) on the x / weight BlockSpecs.

    if k_steps == 1:
        # Grid (N, M): N outer/slowest so a weight N-slice is DMA'd once and
        # reused across every M tile (a single DMA in total when grid_n == 1).
        grid = (grid_n, grid_m)
        kernel = functools.partial(_proj_kernel_kres, **common)
        in_specs = [
            pl.BlockSpec((tm, tk), lambda j, i: (i, 0)),    # x tile
            pl.BlockSpec((tn, tk), lambda j, i: (j, 0)),    # weight N-slice
            pl.BlockSpec((1, tn), lambda j, i: (0, j)),     # bias row
        ]
        out_specs = pl.BlockSpec((tm, tn), lambda j, i: (i, j))
        scratch_shapes = []
        dim_sem = ("parallel", "parallel")
    else:
        grid = (grid_n, grid_m, k_steps)
        if out_dtype == jnp.float32:
            kernel = functools.partial(_proj_kernel_ksplit_f32, **common)
            scratch_shapes = []
        else:
            kernel = functools.partial(_proj_kernel_ksplit, **common)
            scratch_shapes = [pltpu.VMEM((tm, tn), jnp.float32)]
        in_specs = [
            pl.BlockSpec((tm, tk), lambda j, i, kk: (i, kk)),
            pl.BlockSpec((tn, tk), lambda j, i, kk: (j, kk)),
            pl.BlockSpec((1, tn), lambda j, i, kk: (0, j)),
        ]
        out_specs = pl.BlockSpec((tm, tn), lambda j, i, kk: (i, j))
        dim_sem = ("parallel", "parallel", "arbitrary")

    out = pl.pallas_call(
        kernel,
        out_shape=jax.ShapeDtypeStruct((m_pad_f, n_pad_f), out_dtype),
        grid_spec=pltpu.PrefetchScalarGridSpec(
            num_scalar_prefetch=0,
            grid=grid,
            in_specs=in_specs,
            out_specs=out_specs,
            scratch_shapes=scratch_shapes,
        ),
        compiler_params=pltpu.CompilerParams(
            dimension_semantics=dim_sem,
            vmem_limit_bytes=vmem_limit,
        ),
    )(x2d, w_p, b2d)

    out = out[:m, :n]
    return out.reshape(*orig_shape[:-1], n)


if __name__ == "__main__":
    # Shapes implied by the module: inputs [..., input_units] -> [..., num_units].
    batch, seq, input_units, num_units = 2, 8, 32, 16

    key = jax.random.PRNGKey(0)
    kx, kw, kb = jax.random.split(key, 3)

    x = jax.random.normal(kx, (batch, seq, input_units), dtype=jnp.float32)
    weight = jax.random.normal(kw, (num_units, input_units), dtype=jnp.float32) * 0.1
    bias = jax.random.normal(kb, (num_units,), dtype=jnp.float32) * 0.1

    # --- strict f32 path: tight check against the pure-JAX reference --------
    out_f32 = custom_projection(
        x, weight, bias, apply_activation_fn=True,
        activation_fn="sigmoid", matmul_dtype=None)
    jax.block_until_ready(out_f32)
    ref_f32 = jax.nn.sigmoid(x @ weight.T + bias)
    assert out_f32.shape == (batch, seq, num_units)
    assert jnp.allclose(out_f32, ref_f32, atol=1e-5, rtol=1e-5)

    # --- default bf16 MXU-feed path (f32 accumulation) -----------------------
    out_bf16 = custom_projection(
        x, weight, bias, apply_activation_fn=True, activation_fn="sigmoid")
    jax.block_until_ready(out_bf16)
    xb = x.reshape(-1, input_units).astype(jnp.bfloat16)
    wb = weight.astype(jnp.bfloat16)
    ref_bf16 = jax.nn.sigmoid(
        lax.dot_general(xb, wb, (((1,), (1,)), ((), ())),
                        preferred_element_type=jnp.float32) + bias
    ).reshape(batch, seq, num_units)
    assert out_bf16.shape == (batch, seq, num_units)
    assert jnp.allclose(out_bf16, ref_bf16, atol=2e-3, rtol=2e-3)
    assert jnp.allclose(out_bf16, ref_f32, atol=2e-2, rtol=2e-2)

    print("KERNEL_OK")
</pallas_src>

<mosaic_0001>
module attributes {stable_mosaic.version = 11 : i64} {
  func.func @_proj_kernel_kres(%arg0: i32, %arg1: i32, %arg2: memref<8x128xf32, #tpu.memory_space<vmem>>, %arg3: memref<128x128xf32, #tpu.memory_space<vmem>>, %arg4: memref<1x128xf32, #tpu.memory_space<vmem>>, %arg5: memref<8x128xf32, #tpu.memory_space<vmem>>) attributes {dimension_semantics = [#tpu.dimension_semantics<parallel>, #tpu.dimension_semantics<parallel>], iteration_bounds = array<i64: 1, 2>, scalar_prefetch = 0 : i64, scratch_operands = 0 : i64, tpu.core_type = #tpu.core_type<tc>, window_params = [{transform_indices = @transform_0, window_bounds = array<i64: 8, 128>}, {transform_indices = @transform_1, window_bounds = array<i64: 128, 128>}, {transform_indices = @transform_2, window_bounds = array<i64: 1, 128>}, {transform_indices = @transform_3, window_bounds = array<i64: 8, 128>}]} {
    %c0 = arith.constant 0 : index
    %c0_0 = arith.constant 0 : index
    %0 = vector.load %arg2[%c0, %c0_0] : memref<8x128xf32, #tpu.memory_space<vmem>>, vector<8x128xf32>
    %c0_1 = arith.constant 0 : index
    %c0_2 = arith.constant 0 : index
    %1 = vector.load %arg3[%c0_1, %c0_2] : memref<128x128xf32, #tpu.memory_space<vmem>>, vector<128x128xf32>
    %cst = arith.constant dense<0.000000e+00> : vector<8x128xf32>
    %2 = tpu.matmul %0, %1, %cst {dimension_numbers = #tpu.dot_dimension_numbers<[1], [1], [0], [0], [0, 0, 1, 0], [], []>} : vector<8x128xf32>, vector<128x128xf32>, vector<8x128xf32> -> vector<8x128xf32>
    %c0_3 = arith.constant 0 : index
    %c0_4 = arith.constant 0 : index
    %3 = vector.load %arg4[%c0_3, %c0_4] : memref<1x128xf32, #tpu.memory_space<vmem>>, vector<1x128xf32>
    %4 = vector.broadcast %3 : vector<1x128xf32> to vector<8x128xf32>
    %5 = arith.addf %2, %4 : vector<8x128xf32>
    %6 = arith.negf %5 : vector<8x128xf32>
    %7 = math.exp %6 : vector<8x128xf32>
    %cst_5 = arith.constant 1.000000e+00 : f32
    %8 = vector.broadcast %cst_5 : f32 to vector<8x128xf32>
    %9 = arith.addf %8, %7 : vector<8x128xf32>
    %10 = arith.divf %8, %9 : vector<8x128xf32>
    %c0_6 = arith.constant 0 : index
    %c0_7 = arith.constant 0 : index
    %11 = vector.load %arg5[%c0_6, %c0_7] : memref<8x128xf32, #tpu.memory_space<vmem>>, vector<8x128xf32>
    tpu.vector_store %arg5[%c0_6, %c0_7], %10 {strides = array<i32>} : memref<8x128xf32, #tpu.memory_space<vmem>>, vector<8x128xf32>,
    return
  }
  func.func @transform_0(%arg0: i32, %arg1: i32) -> (i32, i32) {
    %c0_i32 = arith.constant 0 : i32
    %c0_i32_0 = arith.constant 0 : i32
    return %arg1, %c0_i32 : i32, i32
  }
  func.func @transform_1(%arg0: i32, %arg1: i32) -> (i32, i32) {
    %c0_i32 = arith.constant 0 : i32
    %c0_i32_0 = arith.constant 0 : i32
    return %arg0, %c0_i32 : i32, i32
  }
  func.func @transform_2(%arg0: i32, %arg1: i32) -> (i32, i32) {
    %c0_i32 = arith.constant 0 : i32
    %c0_i32_0 = arith.constant 0 : i32
    return %c0_i32, %arg0 : i32, i32
  }
  func.func @transform_3(%arg0: i32, %arg1: i32) -> (i32, i32) {
    %c0_i32 = arith.constant 0 : i32
    return %arg1, %arg0 : i32, i32
  }
}

</mosaic_0001>

<bundles_post_ra>
// kernel: tpu_custom_call.1
= control target key start
LH: loop header
LB: loop body
LE: loop exit
PB: predicated region body
PF: predicated region fallthrough
CT: control target
= control target key end

     0   :  { %8 = vsyncpa [#allocation3], 0  ;;  %s844_s0 = inlined_call_operand.hbm [shape: f32[16,128], index: 0, kind: input, shape index: {}]   ;;  %s845_s1 = inlined_call_operand.hbm [shape: f32[128,128], index: 1, kind: input, shape index: {}]   ;;  %s846_s2 = inlined_call_operand.vmem [shape: f32[1,128], index: 2, kind: input, shape index: {}]   ;;  %s847_s3 = inlined_call_operand.hbm [shape: f32[16,128], index: 3, kind: output, shape index: {}]  }
   0x1   :  { %10 = vsyncpa [#allocation3 + $0x1], 0 }
   0x2   :  { %11 = vsyncpa [#allocation6], 0 }
   0x3   :  { %12 = vsyncpa [#allocation4], 0 }
   0x4   :  { %14 = vsyncpa [#allocation4 + $0x1], 0  ;;  %s691_s12 = smov 0   ;;  %s693_s13 = smov 0  }
   0x5   :  { %s695_s14 = smov 0   ;;  %s697_s15 = smov 0  }
   0x6   :  { %s699_s16 = smov 0   ;;  %s701_s17 = smov 0  }
   0x7 LB: > { %s423_s18 = sadd.s32 4294967295, %s666_s17   ;;  %p425_p0 = scmp.ge.s32.totalorder %s666_s17, 1  ;;  %s666_s17 = sphi %s701_s17, %s20_s17   ;;  %s662_s16 = sphi %s699_s16, %s858_s16   ;;  %s658_s15 = sphi %s697_s15, %s857_s15   ;;  %s654_s14 = sphi %s695_s14, %s856_s14   ;;  %s650_s13 = sphi %s693_s13, %s855_s13   ;;  %s646_s12 = sphi %s691_s12, %s854_s12  }
   0x8   : > { %p723_p1 = scmp.eq.s32.totalorder %s423_s18, 0  ;;  %p143_p2 = scmp.lt.s32.totalorder %s666_s17, 3 }
   0x9   : > { %s157_s22 = sshll.u32 %s845_s1, 4  ;;  %s668_s24 = smov [#allocation5]   ;;  %s158_s22 = int_to_ptr.hbm [resolvable:$true] %s157_s22 }
   0xa   : > { %p731_p3 = pnand %p425_p0, %p143_p2  ;;  %s159_s25 = sshll.u32 %s668_s24, 4  ;;  %s160_s25 = int_to_ptr.vmem [resolvable:$true] %s159_s25 }
   0xb   : > { %p428_p6 = scmp.ge.s32.totalorder %s666_s17, 2  ;;  %s669_s26 = smov 128  }
   0xc   : > { %p448_p4 = pneg %p731_p3  ;;  %s670_s27 = smov 8  }
   0xd   : > { %s424_s28 = sadd.s32 4294967294, %s666_s17   ;;  %s29_s29 = sadd.s32 1, %s662_s16 }
   0xe   : > { %p449_p5 = pnand %p448_p4, %p723_p1  ;;  %s39_s30 = sadd.s32 1, %s654_s14 }
   0xf   : > { %p30_p7 = scmp.ge.s32.totalorder %s29_s29, 2  ;;  %p46_p8 = scmp.ne.s32.totalorder %s654_s14, %s650_s13 }
  0x10   : > { %451 = dma.hbm_to_vmem [thread:$0]  (!%p449_p5), %s158_s22, 2048, %s160_s25, [#allocation6], %s669_s26, %s669_s26, %s670_s27  }
  0x11   : > { %p47_p9 = scmp.eq.s32.totalorder %s666_s17, 0  ;;  %p52_p10 = scmp.ne.s32.totalorder %s650_s13, %s646_s12 }
  0x12   : > { %s860_s29 = smov (%p30_p7, %s29_s29), 0  ;;  %p130_p13 = scmp.eq.s32.totalorder %s423_s18, 1 }
  0x13   : > { %p750_p11 = por %p47_p9, %p46_p8  ;;  %p756_p12 = por %p723_p1, %p52_p10 }
  0x14   : > { %s36_s6 = ssub.s32 %s662_s16, %s860_s29  ;;  %p136_p2 = scmp.eq.s32.totalorder %s424_s28, 1 }
  0x15   : > { %p37_p0 = scmp.eq.s32.totalorder %s36_s6, 0  ;;  %p762_p4 = por %p130_p13, %p46_p8 }
  0x16   : > { %p461_p5 = scmp.lt.s32.totalorder %s666_s17, 2  ;;  %p770_p7 = por %p136_p2, %p52_p10 }
  0x17   : > { %s768_s8 = scalar_select %p37_p0, %s654_s14, %s39_s30  }
  0x18   : > { %s179_s10 = sand.u32 1, %s654_s14   ;;  %s430_s20 = sshll.u32 %s662_s16, 3 }
  0x19   : > { %s429_s11 = sshll.u32 %s179_s10, 3  ;;  %s187_s18 = scalar_lea.hbm %s844_s0, %s430_s20 }
  0x1a   : > { %s183_s24 = scalar_lea.vmem [#allocation2], %s429_s11  ;;  %s189_s26 = sshll.u32 %s187_s18, 4  ;;  %s190_s26 = int_to_ptr.hbm [resolvable:$true] %s189_s26 }
  0x1b   : > { %s191_s25 = sshll.u32 %s183_s24, 4  ;;  %p453_p8 = pnand %p461_p5, %p750_p11  ;;  %s192_s25 = int_to_ptr.vmem [resolvable:$true] %s191_s25 }
  0x1c   : > { %s180_s27 = scalar_lea.sflag [#allocation3], %s179_s10  ;;  %200 = sbr.rel (%p731_p3) target bundleno = 259 (0x103), region = 32 }
  0x1d   : > { %455 = dma.hbm_to_vmem [thread:$0]  (!%p453_p8), %s190_s26, 128, %s192_s25, %s180_s27  }
  0x1e   : > { %s784_s28 = sand.u32 (!%p731_p3), 1, %s650_s13  }
  0x1f   : > { %s432_s30 = sshll.u32 (!%p731_p3), %s784_s28, 3  ;;  %s203_s6 = scalar_lea.sflag (!%p731_p3), [#allocation3], %s784_s28 }
  0x20   : > { %s790_s11 = scalar_lea.vmem (!%p731_p3), [#allocation2], %s432_s30 }
  0x21   : > { %633 = dma.done.wait (%p756_p12), %s203_s6, 128  }
  0x22   : > { %635 = vsyncadd (%p756_p12), %s203_s6, 4294967168 }
  0x23   : > { %637 = dma.done.wait (%p723_p1), [#allocation6], 2048  }
  0x24   : > { %639 = vsyncadd (%p723_p1), [#allocation6], 4294965248  ;;  %v258_v0 = vld [vmem:[#allocation5 + $0x78] sm:$0xff]  ;;  %v257_v1 = vld [vmem:[#allocation5 + $0x70] sm:$0xff]  ;;  %s437_s4 = sshll.u32 %s658_s15, 3  ;;  %s237_s21 = scalar_lea.vmem [#allocation7], %s432_s30 }
  0x25   : > { %263 = vmatpush.xpose.msra.mxu0 %v258_v0  ;;  %v256_v2 = vld [vmem:[#allocation5 + $0x68] sm:$0xff]  ;;  %v255_v3 = vld [vmem:[#allocation5 + $0x60] sm:$0xff]  ;;  %v254_v4 = vld [vmem:[#allocation5 + $0x58] sm:$0xff]  ;;  %s315_s20 = scalar_lea.hbm %s847_s3, %s437_s4  ;;  %s317_s22 = sshll.u32 %s237_s21, 4  ;;  %s318_s22 = int_to_ptr.vmem [resolvable:$true] %s317_s22 }
  0x26   : > { %v253_v5 = vld [vmem:[#allocation5 + $0x50] sm:$0xff]  ;;  %v252_v6 = vld [vmem:[#allocation5 + $0x48] sm:$0xff]  ;;  %v251_v7 = vld [vmem:[#allocation5 + $0x40] sm:$0xff]  ;;  %s319_s18 = sshll.u32 %s315_s20, 4  ;;  %s304_s15 = scalar_lea.sflag [#allocation4], %s784_s28  ;;  %s320_s18 = int_to_ptr.hbm [resolvable:$true] %s319_s18 }
  0x27   : > { %v250_v8 = vld [vmem:[#allocation5 + $0x38] sm:$0xff]  ;;  %v249_v9 = vld [vmem:[#allocation5 + $0x30] sm:$0xff]  ;;  %v248_v10 = vld [vmem:[#allocation5 + $0x28] sm:$0xff]  ;;  %s594_s24 = sshra.s32 %s320_s18, 4  ;;  %s600_s30 = scalar_lea.hbm %s847_s3, 16  ;;  %s595_s24 = int_to_ptr.hbm [resolvable:$true] %s594_s24 }
  0x28   : > { %v247_v11 = vld [vmem:[#allocation5 + $0x20] sm:$0xff]  ;;  %v246_v12 = vld [vmem:[#allocation5 + $0x18] sm:$0xff]  ;;  %v245_v13 = vld [vmem:[#allocation5 + $0x10] sm:$0xff]  ;;  %s596_s25 = scalar_lea.hbm %s595_s24, 8  ;;  %p601_p10 = scmp.lt.s32.totalorder %s595_s24, %s847_s3 }
  0x29   : > { %264 = vmatpush.xpose.msra.mxu0 %v257_v1  ;;  %v244_v14 = vld [vmem:[#allocation5 + $0x8] sm:$0xff]  ;;  %v243_v15 = vld [vmem:[#allocation5] sm:$0xff]  ;;  %v242_v16 = vld [vmem:[%s790_s11] sm:$0xff]  ;;  %p597_p1 = scmp.ne.s32.totalorder %s595_s24, %s596_s25  ;;  %p602_p11 = scmp.lt.s32.totalorder %s600_s30, %s596_s25 }
  0x2a   : > { %v515_v17 = vld [vmem:[%s846_s2] ss:$0 sm:$0xff] }
  0x2b   : > { %p598_p3 = pnand %p597_p1, %p762_p4  ;;  %p603_p12 = por %p602_p11, %p601_p10 }
  0x2d   : > { %265 = vmatpush.xpose.msra.mxu0 %v256_v2  ;;  %p599_p9 = pneg %p598_p3 }
  0x2f   : > { %p604_p13 = pnand %p603_p12, %p599_p9 }
  0x31   : > { %266 = vmatpush.xpose.msra.mxu0 %v255_v3 }
  0x35   : > { %267 = vmatpush.xpose.msra.mxu0 %v254_v4 }
  0x39   : > { %268 = vmatpush.xpose.msra.mxu0 %v253_v5 }
  0x3d   : > { %269 = vmatpush.xpose.msra.mxu0 %v252_v6 }
  0x41   : > { %270 = vmatpush.xpose.msra.mxu0 %v251_v7 }
  0x45   : > { %271 = vmatpush.xpose.msra.mxu0 %v250_v8 }
  0x49   : > { %272 = vmatpush.xpose.msra.mxu0 %v249_v9 }
  0x4d   : > { %273 = vmatpush.xpose.msra.mxu0 %v248_v10 }
  0x51   : > { %274 = vmatpush.xpose.msra.mxu0 %v247_v11 }
  0x55   : > { %275 = vmatpush.xpose.msra.mxu0 %v246_v12 }
  0x59   : > { %276 = vmatpush.xpose.msra.mxu0 %v245_v13 }
  0x5d   : > { %277 = vmatpush.xpose.msra.mxu0 %v244_v14 }
  0x61   : > { %278 = vmatpush.xpose.msra.mxu0 %v243_v15 }
  0x64   : > { %279 = vmatmul.f32.vlgmr.msra.gmra.mxu0 %v242_v16 }
  0xe1   : > { %v280_v18 = vpop.f32.mrf.mxu0 }
  0xe2   : > { %v281_v19 = vadd.f32 %v515_v17, %v280_v18 }
  0xe4   : > { %v435_v20 = vmul.f32 -1.442695, %v281_v19 }
  0xe6   : > { %516 = vpow2.f32 %v435_v20 }
  0xec   : > { %v517_v21 = vpop.eup %516 }
  0xed   : > { %v286_v22 = vadd.f32 1.0, %v517_v21 }
  0xef   : > { %518 = vrcp.f32 %v286_v22  ;;  %v298_v26 = vand.u32 2147483648, %v286_v22  ;;  %v296_v28 = vand.u32 2147483647, %v286_v22  ;;  %vm292_vm1 = vweird.f32 %v286_v22 }
  0xf1   : > { %v299_v30 = vor.u32 1.1754944e-38, %v298_v26  ;;  %vm297_vm3 = vcmp.eq.f32.partialorder %v296_v28, 8.507059e+37 }
  0xf5   : > { %v519_v23 = vpop.eup %518 }
  0xf6   : > { %v288_v24 = vmul.f32 %v519_v23, %v286_v22  ;;  %vm293_vm0 = vweird.f32 %v519_v23 }
  0xf7   : > { %vm294_vm2 = vmor %vm292_vm1, %vm293_vm0 }
  0xf8   : > { %v289_v25 = vsub.f32 1.0, %v288_v24 }
  0xfa   : > { %v290_v27 = vmul.f32 %v519_v23, %v289_v25 }
  0xfc   : > { %v291_v29 = vadd.f32 %v519_v23, %v290_v27 }
  0xfe   : > { %v295_v31 = vsel %vm294_vm2, %v519_v23, %v291_v29 }
  0xff   : > { %v300_v32 = vsel %vm297_vm3, %v299_v30, %v295_v31 }
 0x100   : > { %302 = vst [vmem:[%s237_s21] sm:$0xff] %v300_v32 }
 0x101   : > { %607 = shalt.err (!%p604_p13)
}
 0x102   : > { %446 = dma.vmem_to_hbm [thread:$0]  (%p762_p4), %s318_s22, 128, %s320_s18, %s304_s15  }
 0x103 PF: > { %s331_s28 = sand.u32 1, %s646_s12   ;;  %p457_p0 = pnand %p428_p6, %p770_p7 }
 0x104   : > { %s332_s19 = scalar_lea.sflag [#allocation4], %s331_s28 }
 0x105   : > { %p458_p2 = pneg %p457_p0 }
 0x107   : > { %641 = dma.done.wait (%p458_p2), %s332_s19, 128  }
 0x108   : > { %643 = vsyncadd (%p458_p2), %s332_s19, 4294967168  ;;  %s20_s17 = sadd.s32 1, %s666_s17   ;;  %s854_s12 = smov %s650_s13 }
 0x109   : > { %p17_p5 = scmp.ge.s32.totalorder %s20_s17, 4   ;;  %s855_s13 = smov %s654_s14 }
 0x10a   : > { %s856_s14 = smov %s768_s8  ;;  %s857_s15 = smov %s662_s16 }
 0x10b   : > { %s858_s16 = smov %s860_s29  ;;  %19 = sbr.rel (!%p17_p5) target bundleno = 7 (0x7), region = 85 }
 0x110   :  { %338 = vsyncpa [#allocation3], 1 }
 0x111   :  { %340 = vsyncpa [#allocation3 + $0x1], 1 }
 0x112   :  { %341 = vsyncpa [#allocation6], 1 }
 0x113   :  { %342 = vsyncpa [#allocation4], 1 }
 0x114   :  { %344 = vsyncpa [#allocation4 + $0x1], 1 }

</bundles_post_ra>
